<compile_context>
chip_gen: v6e
topology: v6e:2x2x1
jax: 0.10.0
libtpu: 0.0.40
codegen_flags: <defaults>
</compile_context>

<pallas_src>
import jax
import jax.numpy as jnp
from jax.experimental import pallas as pl
from jax.experimental.pallas import tpu as pltpu


def _pool_matmul_kernel(x_ref, w_ref, b_ref, o_ref, acc_ref):
    # x_ref:   (tK, tM)   patches^T tile (output pixels lane-dense on the last axis)
    # w_ref:   (Cout, tK) weight tile
    # b_ref:   (Cout, 1)  bias (f32)
    # o_ref:   (Cout, tM) lane-dense output tile (resident across the K reduction axis)
    # acc_ref: (Cout, tM) f32 accumulator scratch
    k = pl.program_id(2)

    @pl.when(k == 0)
    def _init():
        acc_ref[...] = jnp.zeros_like(acc_ref)

    acc_ref[...] += jnp.dot(
        w_ref[...], x_ref[...], preferred_element_type=jnp.float32
    )

    @pl.when(k == pl.num_programs(2) - 1)
    def _finalize():
        o_ref[...] = (acc_ref[...] + b_ref[...]).astype(o_ref.dtype)


def _round_up(x, m):
    return ((x + m - 1) // m) * m


def _vmem_budgets():
    """Per-generation (vmem_limit_bytes, tile_budget_bytes)."""
    cap = None
    try:
        info = pltpu.get_tpu_info()
        cap = getattr(info, "vmem_capacity_bytes", None)
        if not isinstance(cap, (int, float)):
            cap = None
    except Exception:
        cap = None
    if cap is not None and cap >= 100 * 1024 * 1024:
        # v5e / v6e: 128 MiB physical VMEM -> use it (v5e's default scoped limit is only 16 MiB,
        # so the explicit vmem_limit_bytes below is mandatory there).
        return 64 * 1024 * 1024, 48 * 1024 * 1024
    # v7x (64 MiB per TensorCore) or unknown: stay conservative.
    return 32 * 1024 * 1024, 24 * 1024 * 1024


def _choose_tiles(K, Cout, M_img, in_isz, w_isz, out_isz, tile_budget):
    """Pick (num_k_tiles, tK, tM) under a per-generation VMEM budget.

    tM is the lane tile over output pixels (multiple of 128, floor 512 when possible, or the full
    pixel count when M_img < 128).  tK divides K exactly (the K axis is a reduction: a ragged K
    block would pollute valid outputs, so only exact divisors are allowed).
    """
    small_m = M_img < 128
    max_tM = M_img if small_m else min(8192, (M_img // 128) * 128)
    floor_tM = M_img if small_m else (512 if max_tM >= 512 else 128)

    def cap_cols(tK):
        w_bytes = 2 * Cout * tK * w_isz                              # double-buffered weight tile
        per_col = 2 * tK * in_isz + 2 * Cout * out_isz + 4 * Cout    # dbl-buf in/out + f32 acc
        avail = tile_budget - w_bytes - 64 * 1024                    # bias + slack
        return max(avail // per_col, 0) if avail > 0 else 0

    def as_tile(cols):
        if small_m:
            return M_img  # lane dim must equal the full (sub-128) pixel count
        return min((cols // 128) * 128, max_tM)

    # Keep the resident weight tile modest (matters on v7x's 64 MiB VMEM).
    w_cap = min(8 * 1024 * 1024, tile_budget // 3)
    candidates = [1] + [
        d for d in range(2, K + 1) if K % d == 0 and (K // d) % 8 == 0
    ]

    best, best_cols = None, -1
    for kt in candidates:
        tK = K // kt
        if kt > 1 and 2 * Cout * tK * w_isz > w_cap:
            continue  # weight tile still too big: keep splitting K further
        cols = cap_cols(tK)
        if cols >= floor_tM:
            return kt, tK, as_tile(cols)
        if cols > best_cols:
            fallback_tile = max(as_tile(cols), floor_tM if small_m else 128)
            best, best_cols = (kt, tK, fallback_tile), cols
    return best


def pool2d(x, weight, bias, pool_factor):
    """Pool2d forward.  x: (N, Cin, H, W).  weight: (Cout, Cin, p, p).  bias: (Cout,)."""
    if pool_factor <= 1:
        return x  # nn.Identity()
    if pool_factor not in (2, 4, 8):
        raise ValueError(
            f"Only 1, 2, 4, and 8 are allowed as down-sampling factor, got {pool_factor}"
        )

    N, Cin, H, W = x.shape
    Cout, Cin_w, kh, kw = weight.shape
    p = pool_factor
    assert Cin_w == Cin and kh == p and kw == p

    Hp, Wp = H // p, W // p
    # Conv2d with stride == kernel floors: drop trailing rows/cols without a full window.
    if (Hp * p, Wp * p) != (H, W):
        x = x[:, :, : Hp * p, : Wp * p]

    K = Cin * p * p
    M_img = Hp * Wp

    # bf16 inputs go to the MXU as bf16 (f32 accumulation); everything else computes in f32.
    compute_dtype = jnp.bfloat16 if x.dtype == jnp.bfloat16 else jnp.float32

    # im2col: (N,Cin,Hp,p,Wp,p) -> (N,Cin,p,p,Hp,Wp) -> (N, K, M_img); k = ci*p*p + i*p + j,
    # m = h*Wp + w.  This matches weight.reshape(Cout, K)'s column order.
    # TODO(synk): this is the one remaining extra HBM pass over x (see header note).
    patches = x.reshape(N, Cin, Hp, p, Wp, p)
    patches = jnp.transpose(patches, (0, 1, 3, 5, 2, 4)).reshape(N, K, M_img)
    patches = patches.astype(compute_dtype)  # no-op for f32/bf16 inputs

    w_mat = weight.reshape(Cout, K).astype(compute_dtype)
    b_mat = bias.astype(jnp.float32).reshape(Cout, 1)

    vmem_limit, tile_budget = _vmem_budgets()
    kt, tK, tM = _choose_tiles(
        K, Cout, M_img,
        in_isz=patches.dtype.itemsize,
        w_isz=w_mat.dtype.itemsize,
        out_isz=x.dtype.itemsize,
        tile_budget=tile_budget,
    )

    # v7x has 2 TensorCores: at small batch make sure there are >= 2 parallel pixel tiles
    # (only when each tile can still be >= 512 lanes).
    if N < 4 and M_img >= 2 * 512:
        two_way = _round_up(-(-M_img // 2), 128)
        tM = min(tM, max(512, two_way))

    m_tiles = -(-M_img // tM)  # ceil; a ragged last block is handled by Pallas (writes dropped)
    grid = (m_tiles, N, kt)

    out_flat = pl.pallas_call(
        _pool_matmul_kernel,
        out_shape=jax.ShapeDtypeStruct((N, Cout, M_img), x.dtype),
        grid=grid,
        in_specs=[
            # (tK, tM) patches^T tile: tK is a divisor of K (full K when kt == 1),
            # tM lane-dense (multiple of 128, or the full pixel count when M_img < 128).
            pl.BlockSpec((None, tK, tM), lambda m, n, k: (n, k, m)),
            # weight tile over the K reduction axis; bias resident.
            pl.BlockSpec((Cout, tK), lambda m, n, k: (0, k)),
            pl.BlockSpec((Cout, 1), lambda m, n, k: (0, 0)),
        ],
        out_specs=pl.BlockSpec((None, Cout, tM), lambda m, n, k: (n, 0, m)),
        scratch_shapes=[pltpu.VMEM((Cout, tM), jnp.float32)],
        compiler_params=pltpu.CompilerParams(
            dimension_semantics=("parallel", "parallel", "arbitrary"),
            vmem_limit_bytes=vmem_limit,
        ),
    )(patches, w_mat, b_mat)

    # Free reshape: the kernel already wrote the exact (N, Cout, Hp*Wp) layout.
    return out_flat.reshape(N, Cout, Hp, Wp)


def pool2d_reference(x, weight, bias, pool_factor):
    """Pure-JAX reference of Conv2d with kernel_size == stride (non-overlapping windows)."""
    if pool_factor <= 1:
        return x
    N, Cin, H, W = x.shape
    p = pool_factor
    Hp, Wp = H // p, W // p
    x6 = x[:, :, : Hp * p, : Wp * p].reshape(N, Cin, Hp, p, Wp, p)
    out = jnp.einsum("nchiwj,ocij->nohw", x6, weight)
    return out + bias[None, :, None, None]


if __name__ == "__main__":
    key = jax.random.PRNGKey(0)
    k1, k2, k3 = jax.random.split(key, 3)

    N, Cin, H, W = 2, 4, 16, 16
    Cout, pool_factor = 4, 2

    x = jax.random.normal(k1, (N, Cin, H, W), dtype=jnp.float32)
    # Conv2d weight shape: (Cout, Cin, p, p)
    weight = (
        jax.random.normal(k2, (Cout, Cin, pool_factor, pool_factor), dtype=jnp.float32)
        * 0.1
    )
    bias = jax.random.normal(k3, (Cout,), dtype=jnp.float32) * 0.1

    out = pool2d(x, weight, bias, pool_factor)
    out = jax.block_until_ready(out)

    ref = pool2d_reference(x, weight, bias, pool_factor)
    assert out.shape == (N, Cout, H // pool_factor, W // pool_factor)
    assert jnp.allclose(out, ref, atol=1e-5, rtol=1e-5)

    print("KERNEL_OK")
</pallas_src>

<mosaic_0001>
module attributes {stable_mosaic.version = 11 : i64} {
  func.func @_pool_matmul_kernel(%arg0: i32, %arg1: i32, %arg2: i32, %arg3: memref<1x16x64xf32, #tpu.memory_space<vmem>>, %arg4: memref<4x16xf32, #tpu.memory_space<vmem>>, %arg5: memref<4x1xf32, #tpu.memory_space<vmem>>, %arg6: memref<1x4x64xf32, #tpu.memory_space<vmem>>, %arg7: memref<4x64xf32, #tpu.memory_space<vmem>>) attributes {dimension_semantics = [#tpu.dimension_semantics<parallel>, #tpu.dimension_semantics<parallel>, #tpu.dimension_semantics<arbitrary>], iteration_bounds = array<i64: 1, 2, 1>, scalar_prefetch = 0 : i64, scratch_operands = 1 : i64, tpu.core_type = #tpu.core_type<tc>, window_params = [{transform_indices = @transform_0, window_bounds = array<i64: 1, 16, 64>}, {transform_indices = @transform_1, window_bounds = array<i64: 4, 16>}, {pipeline_mode = #tpu.pipeline_mode<synchronous>, transform_indices = @transform_2, window_bounds = array<i64: 4, 1>}, {transform_indices = @transform_3, window_bounds = array<i64: 1, 4, 64>}]} {
    %c0_i32 = arith.constant 0 : i32
    %0 = arith.cmpi eq, %arg2, %c0_i32 : i32
    %1 = arith.extui %0 : i1 to i32
    %c0_i32_0 = arith.constant 0 : i32
    %2 = arith.cmpi ne, %1, %c0_i32_0 : i32
    scf.if %2 {
      %cst_11 = arith.constant 0.000000e+00 : f32
      %13 = vector.broadcast %cst_11 : f32 to vector<4x64xf32>
      %c0_12 = arith.constant 0 : index
      %c0_13 = arith.constant 0 : index
      %14 = vector.load %arg7[%c0_12, %c0_13] : memref<4x64xf32, #tpu.memory_space<vmem>>, vector<4x64xf32>
      tpu.vector_store %arg7[%c0_12, %c0_13], %13 {strides = array<i32>} : memref<4x64xf32, #tpu.memory_space<vmem>>, vector<4x64xf32>,
    } else {
    }
    %c0 = arith.constant 0 : index
    %c0_1 = arith.constant 0 : index
    %3 = vector.load %arg7[%c0, %c0_1] : memref<4x64xf32, #tpu.memory_space<vmem>>, vector<4x64xf32>
    %c0_2 = arith.constant 0 : index
    %c0_3 = arith.constant 0 : index
    %4 = vector.load %arg4[%c0_2, %c0_3] : memref<4x16xf32, #tpu.memory_space<vmem>>, vector<4x16xf32>
    %c0_4 = arith.constant 0 : index
    %c0_5 = arith.constant 0 : index
    %c0_6 = arith.constant 0 : index
    %5 = vector.load %arg3[%c0_4, %c0_5, %c0_6] : memref<1x16x64xf32, #tpu.memory_space<vmem>>, vector<1x16x64xf32>
    %6 = vector.shape_cast %5 : vector<1x16x64xf32> to vector<16x64xf32>
    %cst = arith.constant dense<0.000000e+00> : vector<4x64xf32>
    %7 = tpu.matmul %4, %6, %cst {dimension_numbers = #tpu.dot_dimension_numbers<[1], [0], [0], [1], [0, 0, 1, 1], [], []>} : vector<4x16xf32>, vector<16x64xf32>, vector<4x64xf32> -> vector<4x64xf32>
    %8 = arith.addf %3, %7 : vector<4x64xf32>
    %c0_7 = arith.constant 0 : index
    %c0_8 = arith.constant 0 : index
    %9 = vector.load %arg7[%c0_7, %c0_8] : memref<4x64xf32, #tpu.memory_space<vmem>>, vector<4x64xf32>
    tpu.vector_store %arg7[%c0_7, %c0_8], %8 {strides = array<i32>} : memref<4x64xf32, #tpu.memory_space<vmem>>, vector<4x64xf32>,
    %c0_i32_9 = arith.constant 0 : i32
    %10 = arith.cmpi eq, %arg2, %c0_i32_9 : i32
    %11 = arith.extui %10 : i1 to i32
    %c0_i32_10 = arith.constant 0 : i32
    %12 = arith.cmpi ne, %11, %c0_i32_10 : i32
    scf.if %12 {
      %c0_11 = arith.constant 0 : index
      %c0_12 = arith.constant 0 : index
      %13 = vector.load %arg7[%c0_11, %c0_12] : memref<4x64xf32, #tpu.memory_space<vmem>>, vector<4x64xf32>
      %c0_13 = arith.constant 0 : index
      %c0_14 = arith.constant 0 : index
      %14 = vector.load %arg5[%c0_13, %c0_14] : memref<4x1xf32, #tpu.memory_space<vmem>>, vector<4x1xf32>
      %15 = vector.broadcast %14 : vector<4x1xf32> to vector<4x64xf32>
      %16 = arith.addf %13, %15 : vector<4x64xf32>
      %c0_15 = arith.constant 0 : index
      %c0_16 = arith.constant 0 : index
      %c0_17 = arith.constant 0 : index
      %17 = vector.load %arg6[%c0_15, %c0_16, %c0_17] : memref<1x4x64xf32, #tpu.memory_space<vmem>>, vector<1x4x64xf32>
      %18 = vector.shape_cast %17 : vector<1x4x64xf32> to vector<4x64xf32>
      %19 = vector.shape_cast %16 : vector<4x64xf32> to vector<1x4x64xf32>
      tpu.vector_store %arg6[%c0_15, %c0_16, %c0_17], %19 {strides = array<i32>} : memref<1x4x64xf32, #tpu.memory_space<vmem>>, vector<1x4x64xf32>,
    } else {
    }
    return
  }
  func.func @transform_0(%arg0: i32, %arg1: i32, %arg2: i32) -> (i32, i32, i32) {
    %c0_i32 = arith.constant 0 : i32
    return %arg1, %arg2, %arg0 : i32, i32, i32
  }
  func.func @transform_1(%arg0: i32, %arg1: i32, %arg2: i32) -> (i32, i32) {
    %c0_i32 = arith.constant 0 : i32
    %c0_i32_0 = arith.constant 0 : i32
    return %c0_i32, %arg2 : i32, i32
  }
  func.func @transform_2(%arg0: i32, %arg1: i32, %arg2: i32) -> (i32, i32) {
    %c0_i32 = arith.constant 0 : i32
    %c0_i32_0 = arith.constant 0 : i32
    %c0_i32_1 = arith.constant 0 : i32
    return %c0_i32, %c0_i32_0 : i32, i32
  }
  func.func @transform_3(%arg0: i32, %arg1: i32, %arg2: i32) -> (i32, i32, i32) {
    %c0_i32 = arith.constant 0 : i32
    %c0_i32_0 = arith.constant 0 : i32
    return %arg1, %c0_i32, %arg0 : i32, i32, i32
  }
}

</mosaic_0001>

<bundles_post_ra>
// kernel: tpu_custom_call.1
= control target key start
LH: loop header
LB: loop body
LE: loop exit
PB: predicated region body
PF: predicated region fallthrough
CT: control target
= control target key end

     0   :  { %8 = vsyncpa [#allocation4], 0  ;;  %s824_s0 = inlined_call_operand.hbm [shape: f32[2,16,64], index: 0, kind: input, shape index: {}]   ;;  %s825_s1 = inlined_call_operand.vmem [shape: f32[4,16], index: 1, kind: input, shape index: {}]   ;;  %s826_s2 = inlined_call_operand.vmem [shape: f32[4,1], index: 2, kind: input, shape index: {}]   ;;  %s827_s3 = inlined_call_operand.hbm [shape: f32[2,4,64], index: 3, kind: output, shape index: {}]  }
   0x1   :  { %10 = vsyncpa [#allocation4 + $0x1], 0 }
   0x2   :  { %11 = vsyncpa [#allocation5], 0 }
   0x3   :  { %13 = vsyncpa [#allocation5 + $0x1], 0  ;;  %s682_s12 = smov 0   ;;  %s684_s13 = smov 0  }
   0x4   :  { %s686_s14 = smov 0   ;;  %s688_s15 = smov 0  }
   0x5   :  { %s690_s16 = smov 0   ;;  %s692_s17 = smov 0  }
   0x6 LB: > { %s450_s18 = sadd.s32 4294967295, %s653_s17   ;;  %s451_s19 = sadd.s32 4294967294, %s653_s17   ;;  %s653_s17 = sphi %s692_s17, %s19_s17   ;;  %s649_s16 = sphi %s690_s16, %s838_s16   ;;  %s645_s15 = sphi %s688_s15, %s837_s15   ;;  %s641_s14 = sphi %s686_s14, %s836_s14   ;;  %s637_s13 = sphi %s684_s13, %s835_s13   ;;  %s633_s12 = sphi %s682_s12, %s834_s12  }
   0x7   : > { %s34_s20 = sadd.s32 1, %s649_s16  ;;  %s49_s21 = sadd.s32 1, %s641_s14 }
   0x8   : > { %p36_p0 = scmp.ge.s32.totalorder %s34_s20, 2  ;;  %p56_p1 = scmp.ne.s32.totalorder %s641_s14, %s637_s13 }
   0x9   : > { %p57_p2 = scmp.eq.s32.totalorder %s653_s17, 0  ;;  %p62_p3 = scmp.ne.s32.totalorder %s637_s13, %s633_s12 }
   0xa   : > { %s840_s20 = smov (%p36_p0, %s34_s20), 0  ;;  %p63_p5 = scmp.eq.s32.totalorder %s450_s18, 0 }
   0xb   : > { %p723_p4 = por %p57_p2, %p56_p1  ;;  %s42_s23 = ssub.s32 %s649_s16, %s840_s20 }
   0xc   : > { %p135_p6 = scmp.eq.s32.totalorder %s450_s18, 1  ;;  %p47_p7 = scmp.eq.s32.totalorder %s42_s23, 0 }
   0xd   : > { %p729_p8 = por %p63_p5, %p62_p3  ;;  %p141_p10 = scmp.eq.s32.totalorder %s451_s19, 1 }
   0xe   : > { %p733_p9 = por %p135_p6, %p56_p1  ;;  %p489_p13 = scmp.lt.s32.totalorder %s653_s17, 2 }
   0xf   : > { %s738_s26 = scalar_select %p47_p7, %s641_s14, %s49_s21  }
  0x10   : > { %p740_p11 = por %p141_p10, %p62_p3  ;;  %s171_s28 = sand.u32 1, %s641_s14  }
  0x11   : > { %s455_s29 = sshll.u32 %s171_s28, 4  ;;  %s466_s30 = sshll.u32 %s649_s16, 8 }
  0x12   : > { %s184_s6 = scalar_lea.hbm %s824_s0, %s466_s30  ;;  %s175_s7 = scalar_lea.vmem [#allocation3], %s455_s29 }
  0x13   : > { %s185_s8 = sshll.u32 %s175_s7, 4  ;;  %p753_p0 = pnand %p489_p13, %p723_p4  ;;  %s186_s8 = int_to_ptr.vmem [resolvable:$true] %s185_s8 }
  0x14   : > { %p458_p1 = scmp.ge.s32.totalorder %s653_s17, 1  ;;  %s172_s10 = scalar_lea.sflag [#allocation4], %s171_s28 }
  0x15   : > { %p547_p2 = pneg %p753_p0  ;;  %s558_s11 = scalar_lea.vmem %s186_s8, 256 }
  0x16   : > { %p559_p3 = scmp.ne.s32.totalorder %s186_s8, %s558_s11  ;;  %s655_s18 = smov [#allocation3]  }
  0x17   : > { %s563_s19 = sshll.u32 %s655_s18, 4  ;;  %s564_s19 = int_to_ptr.vmem [resolvable:$false] %s563_s19 }
  0x18   : > { %p561_p5 = pnand %p559_p3, %p547_p2  ;;  %s565_s21 = scalar_lea.vmem %s564_s19, 512 }
  0x19   : > { %p566_p7 = scmp.lt.s32.totalorder %s186_s8, %s564_s19  ;;  %p567_p10 = scmp.lt.s32.totalorder %s565_s21, %s558_s11 }
  0x1a   : > { %p562_p6 = pneg %p561_p5 }
  0x1b   : > { %p568_p12 = por %p567_p10, %p566_p7 }
  0x1d   : > { %p569_p4 = pnand %p568_p12, %p562_p6 }
  0x1f   : > { %572 = shalt.err (!%p569_p4)
}
  0x20   : > { %s656_s22 = smov 128   ;;  %s657_s23 = smov 8  }
  0x21   : > { %484 = dma.hbm_to_vmem [thread:$0]  (!%p753_p0), %s184_s6, 256, %s186_s8, %s172_s10, %s656_s22, %s656_s22, %s657_s23  }
  0x22   : > { %p193_p13 = scmp.lt.s32.totalorder %s653_s17, 3 }
  0x24   : > { %p194_p2 = pnand %p458_p1, %p193_p13 }
  0x25   : > { %s766_s28 = sand.u32 (!%p194_p2), 1, %s637_s13  }
  0x26   : > { %197 = sbr.rel (%p194_p2) target bundleno = 267 (0x10b), region = 32  ;;  %s459_s29 = sshll.u32 (!%p194_p2), %s766_s28, 4 }
  0x27   : > { %s200_s30 = scalar_lea.sflag (!%p194_p2), [#allocation4], %s766_s28  ;;  %s203_s4 = scalar_lea.vmem (!%p194_p2), [#allocation3], %s459_s29 }
  0x2b   : > { %624 = dma.done.wait (%p729_p8), %s200_s30, 256  }
  0x2c   : > { %626 = vsyncadd (%p729_p8), %s200_s30, 4294967040  ;;  %vm239_vm0 = vcmask 519168   ;;  %v658_v0 = vmov 0.0   ;;  %vm659_vm1 = vmmov 0   ;;  %v660_v1 = vmov 0   ;;  %v244_v2 = vld [vmem:[%s203_s4 + $0x8] sm:$0xff] }
  0x2d   : > { %240 = vst.msk [vmem:[#allocation2] sm:$0xf] %vm239_vm0, %v658_v0  ;;  %470 = vmatprep.subr.mxu0 %v658_v0  ;;  %474 = vmatprep.mubr.msk.f32.mxu0 %vm659_vm1, %v658_v0  ;;  %v243_v3 = vld [vmem:[%s203_s4] sm:$0xff]  ;;  %v242_v4 = vld [vmem:[%s825_s1] sm:$0xf]  ;;  %vm245_vm2 = vcmask 130048  }
  0x2e   : > { %544 = vset.pattern.permute.xlu0 %v660_v1  ;;  %471 = vmatpush3.msra.mxu0 %v244_v2  ;;  %v326_v5 = vld [vmem:[%s826_s2] sm:$0xf]  ;;  %s460_s8 = sshll.u32 %s766_s28, 2  ;;  %s463_s9 = sshll.u32 %s645_s15, 6 }
  0x2f   : > { %472 = vmatprep.subr.mxu0 %v658_v0  ;;  %329 = vperm.xlu0 %544, %v326_v5   ;;  %s229_s10 = scalar_lea.vmem [#allocation6], %s460_s8  ;;  %s347_s21 = scalar_lea.hbm %s827_s3, %s463_s9 }
  0x30   : > { %473 = vmatpush3.msra.mxu0 %v243_v3  ;;  %s349_s11 = sshll.u32 %s229_s10, 4  ;;  %s335_s22 = scalar_lea.sflag [#allocation5], %s766_s28  ;;  %s350_s11 = int_to_ptr.vmem [resolvable:$true] %s349_s11 }
  0x31   : > { %475 = vmatmul.mubr.msk.f32.vlgmr.msra.gmra.mxu0 %vm245_vm2, %v242_v4  ;;  %s573_s23 = scalar_lea.vmem %s350_s11, 64  ;;  %s661_s29 = smov [#allocation6]  }
  0x32   : > { %p574_p8 = scmp.ne.s32.totalorder %s350_s11, %s573_s23  ;;  %s577_s30 = sshll.u32 %s661_s29, 4  ;;  %s578_s30 = int_to_ptr.vmem [resolvable:$false] %s577_s30 }
  0x33   : > { %s579_s15 = scalar_lea.vmem %s578_s30, 128  ;;  %p580_p1 = scmp.lt.s32.totalorder %s350_s11, %s578_s30 }
  0x34   : > { %v241_v6 = vld [vmem:[#allocation2] sm:$0xf]  ;;  %p575_p12 = pnand %p574_p8, %p733_p9  ;;  %p581_p3 = scmp.lt.s32.totalorder %s579_s15, %s573_s23 }
  0x36   : > { %p576_p0 = pneg %p575_p12  ;;  %p582_p5 = por %p581_p3, %p580_p1 }
  0x38   : > { %p583_p6 = pnand %p582_p5, %p576_p0 }
  0xaa   : > { %v330_v10 = vpop.permute.xlu0 %329 }
  0xf1   : > { %v315_v7 = vpop.f32.mrf.mxu0 }
  0xf2   : > { %v319_v8 = vadd.f32 %v315_v7, %v241_v6 }
  0xf3   : > { %v476_v9 = vpop.f32.mrf.mxu0 }
  0xf4   : > { %321 = vst.msk [vmem:[#allocation2] sm:$0xf] %vm239_vm0, %v319_v8 }
  0xfb   : > { %v325_v11 = vld [vmem:[#allocation2] sm:$0xf] }
  0xfc   : > { %v332_v12 = vadd.f32 %v330_v10, %v325_v11 }
  0xfe   : > { %333 = vst.msk [vmem:[%s229_s10] sm:$0xf] %vm239_vm0, %v332_v12 }
  0xff   : > { %586 = shalt.err (!%p583_p6)
}
 0x100   : > { %s587_s4 = scalar_lea.hbm %s347_s21, 64  ;;  %s591_s6 = scalar_lea.hbm %s827_s3, 128 }
 0x101   : > { %p588_p7 = scmp.ne.s32.totalorder %s347_s21, %s587_s4  ;;  %p592_p13 = scmp.lt.s32.totalorder %s347_s21, %s827_s3 }
 0x102   : > { %p593_p2 = scmp.lt.s32.totalorder %s591_s6, %s587_s4 }
 0x103   : > { %p589_p10 = pnand %p588_p7, %p733_p9 }
 0x104   : > { %p594_p8 = por %p593_p2, %p592_p13 }
 0x105   : > { %p590_p4 = pneg %p589_p10 }
 0x107   : > { %p595_p12 = pnand %p594_p8, %p590_p4 }
 0x109   : > { %598 = shalt.err (!%p595_p12)
}
 0x10a   : > { %479 = dma.vmem_to_hbm [thread:$0]  (%p733_p9), %s350_s11, 64, %s347_s21, %s335_s22  }
 0x10b PF: > { %s361_s8 = sand.u32 1, %s633_s12   ;;  %p833_p0 = scmp.ge.s32.totalorder %s653_s17, 2 }
 0x10c   : > { %s362_s9 = scalar_lea.sflag [#allocation5], %s361_s8 }
 0x10d   : > { %p486_p1 = pnand %p833_p0, %p740_p11 }
 0x10f   : > { %p487_p3 = pneg %p486_p1 }
 0x111   : > { %628 = dma.done.wait (%p487_p3), %s362_s9, 64  }
 0x112   : > { %630 = vsyncadd (%p487_p3), %s362_s9, 4294967232  ;;  %s19_s17 = sadd.s32 1, %s653_s17   ;;  %s834_s12 = smov %s637_s13 }
 0x113   : > { %p16_p5 = scmp.ge.s32.totalorder %s19_s17, 4   ;;  %s835_s13 = smov %s641_s14 }
 0x114   : > { %s836_s14 = smov %s738_s26  ;;  %s837_s15 = smov %s649_s16 }
 0x115   : > { %s838_s16 = smov %s840_s20  ;;  %18 = sbr.rel (!%p16_p5) target bundleno = 6 (0x6), region = 88 }
 0x11a   :  { %367 = vsyncpa [#allocation4], 1 }
 0x11b   :  { %369 = vsyncpa [#allocation4 + $0x1], 1 }
 0x11c   :  { %370 = vsyncpa [#allocation5], 1 }
 0x11d   :  { %372 = vsyncpa [#allocation5 + $0x1], 1 }

</bundles_post_ra>
